<compile_context>
chip_gen: v7x
topology: tpu7x:2x2x1
jax: 0.10.0
libtpu: 0.0.40
codegen_flags: <defaults>
</compile_context>

<pallas_src>
import json

import numpy as np
import jax
import jax.numpy as jnp
from jax import lax
from jax.experimental import pallas as pl
from jax.experimental.pallas import tpu as pltpu


def _round_up(x, m):
    return ((x + m - 1) // m) * m


NEG = -1.0e30  # finite "minus infinity" mask fill (must stay finite: 0*NEG==0)


# ------------------------- Kernel A: per-cluster max ------------------------ #
def _make_cluster_max_kernel(C_pad, Hp, tk):
    n_groups = C_pad // 8

    def kernel(flags_ref,      # SMEM (B,) int32 scalar prefetch: has-cluster flag
               cidk_ref,       # (1, tk, 1)  int32  cluster id per key row (-1 = none)
               xk_ref,         # (1, tk, Hp) f32    key rows
               cm_ref):        # (1, C_pad, Hp) f32 per-cluster max (resident accumulator)
        b = pl.program_id(0)
        kc = pl.program_id(1)

        @pl.when(kc == 0)
        def _():
            cm_ref[0] = jnp.full((C_pad, Hp), NEG, jnp.float32)

        @pl.when(flags_ref[b] > 0)
        def _():
            xk = xk_ref[0]            # (tk, Hp) loaded once, reused for all clusters
            cid = cidk_ref[0]         # (tk, 1)  int32
            cm_view = cm_ref.at[0]    # (C_pad, Hp) ref view
            for g in range(n_groups):                              # static unroll
                rows = [jnp.max(jnp.where(cid == (g * 8 + r), xk, NEG),
                                axis=0, keepdims=True)
                        for r in range(8)]
                grp = jnp.concatenate(rows, axis=0)                # (8, Hp)
                sl = pl.ds(g * 8, 8)
                cm_view[sl, :] = jnp.maximum(cm_view[sl, :], grp)

    return kernel


# --------------------- Kernel B: rep gather + tanh(Linear) ------------------ #
def _make_merge_kernel(C_pad, Hp, tq, compute_dtype):

    def kernel(flags_ref,      # SMEM (B,) int32
               cidq_ref,       # (1, tq, 1)  int32 cluster id per query row
               xq_ref,         # (1, tq, Hp) f32   query rows
               cm_ref,         # (1, C_pad, Hp) f32 per-cluster max
               w1t_ref,        # (Hp, Hp) compute_dtype   W[:, :H].T (padded)
               w2t_ref,        # (Hp, Hp) compute_dtype   W[:, H:].T (padded)
               b_ref,          # (1, Hp)  f32 bias (padded)
               o_ref):         # (1, tq, Hp) f32
        b = pl.program_id(0)
        has = flags_ref[b] > 0
        x_q = xq_ref[0]                                        # (tq, Hp)

        @pl.when(jnp.logical_not(has))
        def _():
            # example has no coref clusters at all -> pure pass-through
            o_ref[0] = x_q

        @pl.when(has)
        def _():
            cid_q = cidq_ref[0]                                # (tq, 1) int32
            lane_ids = lax.broadcasted_iota(jnp.int32, (tq, C_pad), 1)
            onehot = (cid_q == lane_ids).astype(compute_dtype)  # (tq, C_pad)
            in_row = cid_q >= 0                                 # (tq, 1) bool

            # rep = onehot @ cm  -- exact for strictly one-hot rows (NEG finite,
            # 0 * NEG == 0), runs on the otherwise-idle MXU, no 3-D temporary.
            rep = jnp.dot(onehot, cm_ref[0].astype(compute_dtype),
                          preferred_element_type=jnp.float32)   # (tq, Hp) f32

            # Linear(concat([x, rep])) == x @ W1^T + rep @ W2^T + b
            merged = jnp.tanh(
                jnp.dot(x_q.astype(compute_dtype), w1t_ref[...],
                        preferred_element_type=jnp.float32)
                + jnp.dot(rep.astype(compute_dtype), w2t_ref[...],
                          preferred_element_type=jnp.float32)
                + b_ref[...])
            o_ref[0] = jnp.where(in_row, merged, x_q)

    return kernel


# -------------------------------- wrapper ----------------------------------- #
def coref_merge_max_pool(m_bank, cluster_id, W, b, *, tq=None,
                         matmul_dtype=jnp.float32):
    """m_bank: (src_len, batch, hidden) f32; cluster_id: (batch, src_len) int32
       (-1 = position not in any coref cluster); W: (H, 2H); b: (H,).
       Returns (src_len, batch, hidden) f32.
       matmul_dtype=jnp.bfloat16 uses the bf16-native MXU path (v6e/v7x) with
       f32 accumulation (slightly looser numerics)."""
    S, B, H = m_bank.shape
    cid = np.asarray(cluster_id, dtype=np.int32)
    assert cid.shape == (B, S)

    # ---- tile / pad geometry -------------------------------------------------
    Hp = _round_up(H, 128)                      # lane-dense hidden dim
    S8 = _round_up(S, 8)
    if tq is None:
        tq = min(256, S8)                       # query-row tile (kernel B)
    else:
        tq = max(8, min(_round_up(tq, 8), S8))
    S_pad = _round_up(S8, tq)
    Q = S_pad // tq
    # key chunk (kernel A grid block): largest multiple of 8 dividing S_pad, <=512
    tk = max(m for m in range(8, min(512, S_pad) + 1, 8) if S_pad % m == 0)
    Kc = S_pad // tk
    C_act = int(cid.max()) + 1 if cid.size and int(cid.max()) >= 0 else 0
    C_pad = max(8, _round_up(max(C_act, 1), 8))

    # ---- host-side dense encodings --------------------------------------------
    cid_pad = np.full((B, S_pad), -1, dtype=np.int32)
    cid_pad[:, :S] = cid
    cid3 = jnp.asarray(cid_pad[:, :, None])                               # (B, S_pad, 1)
    flags = jnp.asarray((cid >= 0).any(axis=1).astype(np.int32))          # (B,)

    # TODO(synk): accepting/emitting a (B, S, H) layout upstream would remove
    # these extra HBM passes (transpose + pad + slice/transpose).
    x = jnp.transpose(jnp.asarray(m_bank, jnp.float32), (1, 0, 2))        # (B, S, H)
    x = jnp.pad(x, ((0, 0), (0, S_pad - S), (0, Hp - H)))                 # (B, S_pad, Hp)

    Wf = jnp.asarray(W, jnp.float32)
    w1t = jnp.zeros((Hp, Hp), jnp.float32).at[:H, :H].set(Wf[:, :H].T).astype(matmul_dtype)
    w2t = jnp.zeros((Hp, Hp), jnp.float32).at[:H, :H].set(Wf[:, H:].T).astype(matmul_dtype)
    bias = jnp.zeros((1, Hp), jnp.float32).at[0, :H].set(jnp.asarray(b, jnp.float32))

    wbytes = jnp.dtype(matmul_dtype).itemsize

    # ---- kernel A: per-cluster max --------------------------------------------
    def gated_key_map(bi, kc, flg):
        # cluster-free examples map to a constant block -> their DMAs are skipped
        sel = (flg[bi] > 0).astype(jnp.int32)
        return (bi * sel, kc * sel, 0)

    bytes_a = 4 * (2 * tk * 1 + 2 * tk * Hp + 2 * C_pad * Hp + 3 * tk * Hp)
    vmem_a = int(min(56 << 20, max(16 << 20, 2 * bytes_a)))

    cm = pl.pallas_call(
        _make_cluster_max_kernel(C_pad, Hp, tk),
        out_shape=jax.ShapeDtypeStruct((B, C_pad, Hp), jnp.float32),
        grid_spec=pltpu.PrefetchScalarGridSpec(
            num_scalar_prefetch=1,
            grid=(B, Kc),
            in_specs=[
                pl.BlockSpec((1, tk, 1), gated_key_map),     # key cluster ids
                pl.BlockSpec((1, tk, Hp), gated_key_map),    # key rows
            ],
            out_specs=pl.BlockSpec((1, C_pad, Hp), lambda bi, kc, flg: (bi, 0, 0)),
        ),
        compiler_params=pltpu.CompilerParams(
            dimension_semantics=("parallel", "arbitrary"),
            vmem_limit_bytes=vmem_a),
    )(flags, cid3, x)

    # ---- kernel B: rep gather (MXU) + tanh(Linear) -----------------------------
    bytes_b = (4 * (2 * tq * 1 + 2 * tq * Hp + 2 * C_pad * Hp + 2 * Hp
                    + 2 * tq * Hp + 3 * tq * Hp)
               + wbytes * (4 * Hp * Hp + tq * C_pad))
    vmem_b = int(min(56 << 20, max(16 << 20, 2 * bytes_b)))

    out = pl.pallas_call(
        _make_merge_kernel(C_pad, Hp, tq, matmul_dtype),
        out_shape=jax.ShapeDtypeStruct((B, S_pad, Hp), jnp.float32),
        grid_spec=pltpu.PrefetchScalarGridSpec(
            num_scalar_prefetch=1,
            grid=(B, Q),
            in_specs=[
                pl.BlockSpec((1, tq, 1), lambda bi, qi, flg: (bi, qi, 0)),    # query ids
                pl.BlockSpec((1, tq, Hp), lambda bi, qi, flg: (bi, qi, 0)),   # query rows
                pl.BlockSpec((1, C_pad, Hp), lambda bi, qi, flg: (bi, 0, 0)), # cluster max
                pl.BlockSpec((Hp, Hp), lambda bi, qi, flg: (0, 0)),
                pl.BlockSpec((Hp, Hp), lambda bi, qi, flg: (0, 0)),
                pl.BlockSpec((1, Hp), lambda bi, qi, flg: (0, 0)),
            ],
            out_specs=pl.BlockSpec((1, tq, Hp), lambda bi, qi, flg: (bi, qi, 0)),
        ),
        compiler_params=pltpu.CompilerParams(
            dimension_semantics=("parallel", "parallel"),
            vmem_limit_bytes=vmem_b),
    )(flags, cid3, x, cm, w1t, w2t, bias)

    out = out[:, :S, :H]
    return jnp.transpose(out, (1, 0, 2))                                   # (S, B, H)


# ------------------------------ Python glue --------------------------------- #
def preprocess(corefs):
    """Same semantics as CorefMergeLayer.preprocess (JSON string parsing)."""
    b_coref_posi, b_coref_score = [], []
    for coref in corefs:
        coref = json.loads(coref)
        ex_posi, ex_score = [], []
        for clustr in coref:
            m_posi_list = clustr['m_posi_list']
            m_scores = clustr['m_coref_scores_list']
            assert len(m_posi_list) == len(m_scores)
            ex_posi.append([int(span[1]) - 1 for span in m_posi_list])
            ex_score.append([[float(sc) for sc in row] for row in m_scores])
        b_coref_posi.append(ex_posi)
        b_coref_score.append(ex_score)
    return b_coref_posi, b_coref_score


def clusters_to_ids(b_coref_posi, batch, src_len):
    """Dense per-position cluster id; -1 = position not in any coref cluster."""
    cid = np.full((batch, src_len), -1, dtype=np.int32)
    for ex, ex_posi in enumerate(b_coref_posi):
        for c, posi_list in enumerate(ex_posi):
            for p in posi_list:
                assert cid[ex, p] == -1  # positions are unique across clusters
                cid[ex, p] = c
    return cid


def reference_forward(m_bank, b_coref_posi, W, b):
    """Pure-numpy mirror of CorefMergeLayer.forward (merge_type='max_pool')."""
    m_bank = np.asarray(m_bank, dtype=np.float32)
    W = np.asarray(W, dtype=np.float32)
    b = np.asarray(b, dtype=np.float32)
    S, B, H = m_bank.shape
    out = m_bank.copy()
    for ex in range(B):
        ex_bank = m_bank[:, ex, :]
        for posi_list in b_coref_posi[ex]:
            if len(posi_list) == 0:
                continue
            cl = ex_bank[np.asarray(posi_list)]                  # (k, H)
            rep = np.broadcast_to(cl.max(0, keepdims=True), cl.shape)
            mrg = np.tanh(np.concatenate([cl, rep], axis=1) @ W.T + b)
            for i, pos in enumerate(posi_list):
                out[pos, ex] = mrg[i]
    return out


# --------------------------------- main -------------------------------------- #
if __name__ == "__main__":
    src_len, batch, hidden = 16, 3, 32

    key = jax.random.PRNGKey(0)
    k1, k2, k3 = jax.random.split(key, 3)
    m_bank = jax.random.normal(k1, (src_len, batch, hidden), dtype=jnp.float32)
    W = jax.random.normal(k2, (hidden, 2 * hidden), dtype=jnp.float32) * 0.1
    b = jax.random.normal(k3, (hidden,), dtype=jnp.float32) * 0.1

    # Deterministic coref JSON strings (spans -> last-token positions: span[1]-1).
    # Third example has no clusters (exercises the scalar-prefetch pass-through
    # gate AND the flag-gated index maps that skip its key DMAs).
    corefs = [
        json.dumps([
            {"m_posi_list": [[0, 3], [5, 8]],
             "m_coref_scores_list": [[0.9, 0.1], [0.2, 0.8]]},
            {"m_posi_list": [[9, 11], [12, 14], [14, 16]],
             "m_coref_scores_list": [[0.5, 0.3, 0.2], [0.1, 0.7, 0.2], [0.3, 0.3, 0.4]]},
        ]),
        json.dumps([
            {"m_posi_list": [[1, 2], [3, 5], [8, 10]],
             "m_coref_scores_list": [[0.6, 0.2, 0.2], [0.2, 0.6, 0.2], [0.1, 0.1, 0.8]]},
        ]),
        json.dumps([]),
    ]

    b_coref_posi, _b_coref_score = preprocess(corefs)
    cluster_id = clusters_to_ids(b_coref_posi, batch, src_len)
    ref = reference_forward(np.asarray(m_bank), b_coref_posi, np.asarray(W), np.asarray(b))

    # Default tiling (single query tile per example), f32 matmul path.
    out = jax.block_until_ready(coref_merge_max_pool(m_bank, cluster_id, W, b))
    np.testing.assert_allclose(np.asarray(out), ref, rtol=1e-5, atol=5e-5)

    # Forced multi-tile query axis (tq=8 -> 2 query tiles) to exercise the
    # per-example cluster-max reuse across kernel-B grid steps.
    out2 = jax.block_until_ready(coref_merge_max_pool(m_bank, cluster_id, W, b, tq=8))
    np.testing.assert_allclose(np.asarray(out2), ref, rtol=1e-5, atol=5e-5)

    # bf16 matmul operands (v6e/v7x MXU-native path), f32 accumulation.
    out3 = jax.block_until_ready(
        coref_merge_max_pool(m_bank, cluster_id, W, b, matmul_dtype=jnp.bfloat16))
    np.testing.assert_allclose(np.asarray(out3), ref, rtol=5e-2, atol=5e-2)

    print("KERNEL_OK")
</pallas_src>

<mosaic_0001>
module attributes {stable_mosaic.version = 11 : i64} {
  func.func @kernel(%arg0: i32, %arg1: i32, %arg2: memref<3xi32, #tpu.memory_space<smem>>, %arg3: memref<1x16x1xi32, #tpu.memory_space<vmem>>, %arg4: memref<1x16x128xf32, #tpu.memory_space<vmem>>, %arg5: memref<1x8x128xf32, #tpu.memory_space<vmem>>) attributes {dimension_semantics = [#tpu.dimension_semantics<parallel>, #tpu.dimension_semantics<arbitrary>], iteration_bounds = array<i64: 3, 1>, scalar_prefetch = 1 : i64, scratch_operands = 0 : i64, tpu.core_type = #tpu.core_type<tc>, window_params = [{transform_indices = @transform_0, window_bounds = array<i64: 1, 16, 1>}, {transform_indices = @transform_1, window_bounds = array<i64: 1, 16, 128>}, {transform_indices = @transform_2, window_bounds = array<i64: 1, 8, 128>}]} {
    %c0_i32 = arith.constant 0 : i32
    %0 = arith.cmpi eq, %arg1, %c0_i32 : i32
    %1 = arith.extui %0 : i1 to i32
    %c0_i32_0 = arith.constant 0 : i32
    %2 = arith.cmpi ne, %1, %c0_i32_0 : i32
    scf.if %2 {
      %cst = arith.constant -1.000000e+30 : f32
      %8 = vector.broadcast %cst : f32 to vector<8x128xf32>
      %c0 = arith.constant 0 : index
      %c0_3 = arith.constant 0 : index
      %c0_4 = arith.constant 0 : index
      %9 = vector.load %arg5[%c0, %c0_3, %c0_4] : memref<1x8x128xf32, #tpu.memory_space<vmem>>, vector<1x8x128xf32>
      %10 = vector.shape_cast %9 : vector<1x8x128xf32> to vector<8x128xf32>
      %11 = vector.shape_cast %8 : vector<8x128xf32> to vector<1x8x128xf32>
      tpu.vector_store %arg5[%c0, %c0_3, %c0_4], %11 {strides = array<i32>} : memref<1x8x128xf32, #tpu.memory_space<vmem>>, vector<1x8x128xf32>,
    } else {
    }
    %3 = arith.index_cast %arg0 : i32 to index
    %4 = memref.load %arg2[%3] : memref<3xi32, #tpu.memory_space<smem>>
    %c0_i32_1 = arith.constant 0 : i32
    %5 = arith.cmpi sgt, %4, %c0_i32_1 : i32
    %6 = arith.extui %5 : i1 to i32
    %c0_i32_2 = arith.constant 0 : i32
    %7 = arith.cmpi ne, %6, %c0_i32_2 : i32
    scf.if %7 {
      %c0 = arith.constant 0 : index
      %c0_3 = arith.constant 0 : index
      %c0_4 = arith.constant 0 : index
      %8 = vector.load %arg4[%c0, %c0_3, %c0_4] : memref<1x16x128xf32, #tpu.memory_space<vmem>>, vector<1x16x128xf32>
      %9 = vector.shape_cast %8 : vector<1x16x128xf32> to vector<16x128xf32>
      %c0_5 = arith.constant 0 : index
      %c0_6 = arith.constant 0 : index
      %c0_7 = arith.constant 0 : index
      %10 = vector.load %arg3[%c0_5, %c0_6, %c0_7] : memref<1x16x1xi32, #tpu.memory_space<vmem>>, vector<1x16x1xi32>
      %11 = vector.shape_cast %10 : vector<1x16x1xi32> to vector<16x1xi32>
      %c0_i32_8 = arith.constant 0 : i32
      %12 = vector.broadcast %c0_i32_8 : i32 to vector<16x1xi32>
      %13 = arith.cmpi eq, %11, %12 : vector<16x1xi32>
      %cst = arith.constant -1.000000e+30 : f32
      %14 = vector.shape_cast %13 : vector<16x1xi1> to vector<16x1xi1>
      %15 = vector.broadcast %14 : vector<16x1xi1> to vector<16x128xi1>
      %16 = vector.broadcast %cst : f32 to vector<16x128xf32>
      %17 = arith.select %15, %9, %16 : vector<16x128xi1>, vector<16x128xf32>
      %cst_9 = arith.constant dense<0xFF800000> : vector<128xf32>
      %18 = vector.multi_reduction <maximumf>, %17, %cst_9 [0] : vector<16x128xf32> to vector<128xf32>
      %19 = vector.shape_cast %18 : vector<128xf32> to vector<1x128xf32>
      %c1_i32 = arith.constant 1 : i32
      %20 = vector.broadcast %c1_i32 : i32 to vector<16x1xi32>
      %21 = arith.cmpi eq, %11, %20 : vector<16x1xi32>
      %cst_10 = arith.constant -1.000000e+30 : f32
      %22 = vector.shape_cast %21 : vector<16x1xi1> to vector<16x1xi1>
      %23 = vector.broadcast %22 : vector<16x1xi1> to vector<16x128xi1>
      %24 = vector.broadcast %cst_10 : f32 to vector<16x128xf32>
      %25 = arith.select %23, %9, %24 : vector<16x128xi1>, vector<16x128xf32>
      %cst_11 = arith.constant dense<0xFF800000> : vector<128xf32>
      %26 = vector.multi_reduction <maximumf>, %25, %cst_11 [0] : vector<16x128xf32> to vector<128xf32>
      %27 = vector.shape_cast %26 : vector<128xf32> to vector<1x128xf32>
      %c2_i32 = arith.constant 2 : i32
      %28 = vector.broadcast %c2_i32 : i32 to vector<16x1xi32>
      %29 = arith.cmpi eq, %11, %28 : vector<16x1xi32>
      %cst_12 = arith.constant -1.000000e+30 : f32
      %30 = vector.shape_cast %29 : vector<16x1xi1> to vector<16x1xi1>
      %31 = vector.broadcast %30 : vector<16x1xi1> to vector<16x128xi1>
      %32 = vector.broadcast %cst_12 : f32 to vector<16x128xf32>
      %33 = arith.select %31, %9, %32 : vector<16x128xi1>, vector<16x128xf32>
      %cst_13 = arith.constant dense<0xFF800000> : vector<128xf32>
      %34 = vector.multi_reduction <maximumf>, %33, %cst_13 [0] : vector<16x128xf32> to vector<128xf32>
      %35 = vector.shape_cast %34 : vector<128xf32> to vector<1x128xf32>
      %c3_i32 = arith.constant 3 : i32
      %36 = vector.broadcast %c3_i32 : i32 to vector<16x1xi32>
      %37 = arith.cmpi eq, %11, %36 : vector<16x1xi32>
      %cst_14 = arith.constant -1.000000e+30 : f32
      %38 = vector.shape_cast %37 : vector<16x1xi1> to vector<16x1xi1>
      %39 = vector.broadcast %38 : vector<16x1xi1> to vector<16x128xi1>
      %40 = vector.broadcast %cst_14 : f32 to vector<16x128xf32>
      %41 = arith.select %39, %9, %40 : vector<16x128xi1>, vector<16x128xf32>
      %cst_15 = arith.constant dense<0xFF800000> : vector<128xf32>
      %42 = vector.multi_reduction <maximumf>, %41, %cst_15 [0] : vector<16x128xf32> to vector<128xf32>
      %43 = vector.shape_cast %42 : vector<128xf32> to vector<1x128xf32>
      %c4_i32 = arith.constant 4 : i32
      %44 = vector.broadcast %c4_i32 : i32 to vector<16x1xi32>
      %45 = arith.cmpi eq, %11, %44 : vector<16x1xi32>
      %cst_16 = arith.constant -1.000000e+30 : f32
      %46 = vector.shape_cast %45 : vector<16x1xi1> to vector<16x1xi1>
      %47 = vector.broadcast %46 : vector<16x1xi1> to vector<16x128xi1>
      %48 = vector.broadcast %cst_16 : f32 to vector<16x128xf32>
      %49 = arith.select %47, %9, %48 : vector<16x128xi1>, vector<16x128xf32>
      %cst_17 = arith.constant dense<0xFF800000> : vector<128xf32>
      %50 = vector.multi_reduction <maximumf>, %49, %cst_17 [0] : vector<16x128xf32> to vector<128xf32>
      %51 = vector.shape_cast %50 : vector<128xf32> to vector<1x128xf32>
      %c5_i32 = arith.constant 5 : i32
      %52 = vector.broadcast %c5_i32 : i32 to vector<16x1xi32>
      %53 = arith.cmpi eq, %11, %52 : vector<16x1xi32>
      %cst_18 = arith.constant -1.000000e+30 : f32
      %54 = vector.shape_cast %53 : vector<16x1xi1> to vector<16x1xi1>
      %55 = vector.broadcast %54 : vector<16x1xi1> to vector<16x128xi1>
      %56 = vector.broadcast %cst_18 : f32 to vector<16x128xf32>
      %57 = arith.select %55, %9, %56 : vector<16x128xi1>, vector<16x128xf32>
      %cst_19 = arith.constant dense<0xFF800000> : vector<128xf32>
      %58 = vector.multi_reduction <maximumf>, %57, %cst_19 [0] : vector<16x128xf32> to vector<128xf32>
      %59 = vector.shape_cast %58 : vector<128xf32> to vector<1x128xf32>
      %c6_i32 = arith.constant 6 : i32
      %60 = vector.broadcast %c6_i32 : i32 to vector<16x1xi32>
      %61 = arith.cmpi eq, %11, %60 : vector<16x1xi32>
      %cst_20 = arith.constant -1.000000e+30 : f32
      %62 = vector.shape_cast %61 : vector<16x1xi1> to vector<16x1xi1>
      %63 = vector.broadcast %62 : vector<16x1xi1> to vector<16x128xi1>
      %64 = vector.broadcast %cst_20 : f32 to vector<16x128xf32>
      %65 = arith.select %63, %9, %64 : vector<16x128xi1>, vector<16x128xf32>
      %cst_21 = arith.constant dense<0xFF800000> : vector<128xf32>
      %66 = vector.multi_reduction <maximumf>, %65, %cst_21 [0] : vector<16x128xf32> to vector<128xf32>
      %67 = vector.shape_cast %66 : vector<128xf32> to vector<1x128xf32>
      %c7_i32 = arith.constant 7 : i32
      %68 = vector.broadcast %c7_i32 : i32 to vector<16x1xi32>
      %69 = arith.cmpi eq, %11, %68 : vector<16x1xi32>
      %cst_22 = arith.constant -1.000000e+30 : f32
      %70 = vector.shape_cast %69 : vector<16x1xi1> to vector<16x1xi1>
      %71 = vector.broadcast %70 : vector<16x1xi1> to vector<16x128xi1>
      %72 = vector.broadcast %cst_22 : f32 to vector<16x128xf32>
      %73 = arith.select %71, %9, %72 : vector<16x128xi1>, vector<16x128xf32>
      %cst_23 = arith.constant dense<0xFF800000> : vector<128xf32>
      %74 = vector.multi_reduction <maximumf>, %73, %cst_23 [0] : vector<16x128xf32> to vector<128xf32>
      %75 = vector.shape_cast %74 : vector<128xf32> to vector<1x128xf32>
      %76 = tpu.concatenate %19, %27, %35, %43, %51, %59, %67, %75 in 0 : vector<1x128xf32>, vector<1x128xf32>, vector<1x128xf32>, vector<1x128xf32>, vector<1x128xf32>, vector<1x128xf32>, vector<1x128xf32>, vector<1x128xf32> -> vector<8x128xf32>
      %c0_i32_24 = arith.constant 0 : i32
      %c0_i32_25 = arith.constant 0 : i32
      %c0_i32_26 = arith.constant 0 : i32
      %77 = tpu.memref_slice %arg5[%c0_i32_24, %c0_i32_25, %c0_i32_26] : memref<1x8x128xf32, #tpu.memory_space<vmem>> -> memref<1x8x128xf32, #tpu.memory_space<vmem>>
      %78 = tpu.memref_squeeze %77 : memref<1x8x128xf32, #tpu.memory_space<vmem>> -> memref<8x128xf32, #tpu.memory_space<vmem>>
      %c0_27 = arith.constant 0 : index
      %c0_28 = arith.constant 0 : index
      %79 = vector.load %78[%c0_27, %c0_28] : memref<8x128xf32, #tpu.memory_space<vmem>>, vector<8x128xf32>
      %80 = arith.maximumf %79, %76 : vector<8x128xf32>
      %c0_i32_29 = arith.constant 0 : i32
      %c0_i32_30 = arith.constant 0 : i32
      %c0_i32_31 = arith.constant 0 : i32
      %81 = tpu.memref_slice %arg5[%c0_i32_29, %c0_i32_30, %c0_i32_31] : memref<1x8x128xf32, #tpu.memory_space<vmem>> -> memref<1x8x128xf32, #tpu.memory_space<vmem>>
      %82 = tpu.memref_squeeze %81 : memref<1x8x128xf32, #tpu.memory_space<vmem>> -> memref<8x128xf32, #tpu.memory_space<vmem>>
      %c0_32 = arith.constant 0 : index
      %c0_33 = arith.constant 0 : index
      %83 = vector.load %82[%c0_32, %c0_33] : memref<8x128xf32, #tpu.memory_space<vmem>>, vector<8x128xf32>
      tpu.vector_store %82[%c0_32, %c0_33], %80 {strides = array<i32>} : memref<8x128xf32, #tpu.memory_space<vmem>>, vector<8x128xf32>,
    } else {
    }
    return
  }
  func.func @transform_0(%arg0: i32, %arg1: i32, %arg2: memref<3xi32, #tpu.memory_space<smem>>) -> (i32, i32, i32) {
    %0 = arith.index_cast %arg0 : i32 to index
    %1 = memref.load %arg2[%0] : memref<3xi32, #tpu.memory_space<smem>>
    %c0_i32 = arith.constant 0 : i32
    %2 = arith.cmpi sgt, %1, %c0_i32 : i32
    %3 = arith.extui %2 : i1 to i32
    %4 = arith.muli %arg0, %3 : i32
    %5 = arith.muli %arg1, %3 : i32
    %c0_i32_0 = arith.constant 0 : i32
    %c0_i32_1 = arith.constant 0 : i32
    return %4, %5, %c0_i32_0 : i32, i32, i32
  }
  func.func @transform_1(%arg0: i32, %arg1: i32, %arg2: memref<3xi32, #tpu.memory_space<smem>>) -> (i32, i32, i32) {
    %0 = arith.index_cast %arg0 : i32 to index
    %1 = memref.load %arg2[%0] : memref<3xi32, #tpu.memory_space<smem>>
    %c0_i32 = arith.constant 0 : i32
    %2 = arith.cmpi sgt, %1, %c0_i32 : i32
    %3 = arith.extui %2 : i1 to i32
    %4 = arith.muli %arg0, %3 : i32
    %5 = arith.muli %arg1, %3 : i32
    %c0_i32_0 = arith.constant 0 : i32
    %c0_i32_1 = arith.constant 0 : i32
    return %4, %5, %c0_i32_0 : i32, i32, i32
  }
  func.func @transform_2(%arg0: i32, %arg1: i32, %arg2: memref<3xi32, #tpu.memory_space<smem>>) -> (i32, i32, i32) {
    %c0_i32 = arith.constant 0 : i32
    %c0_i32_0 = arith.constant 0 : i32
    %c0_i32_1 = arith.constant 0 : i32
    return %arg0, %c0_i32, %c0_i32_0 : i32, i32, i32
  }
}

</mosaic_0001>

<bundles_post_ra>
// kernel: tpu_custom_call.1
= control target key start
LH: loop header
LB: loop body
LE: loop exit
PB: predicated region body
PF: predicated region fallthrough
CT: control target
= control target key end

     0   :  { %s931_s0 = inlined_call_operand.vmem [shape: s32[3], index: 0, kind: input, shape index: {}]   ;;  %s932_s1 = inlined_call_operand.vmem [shape: s32[3,16,1], index: 1, kind: input, shape index: {}]   ;;  %s933_s2 = inlined_call_operand.vmem [shape: f32[3,16,128], index: 2, kind: input, shape index: {}]   ;;  %s934_s3 = inlined_call_operand.hbm [shape: f32[3,8,128], index: 3, kind: output, shape index: {}]  }
   0x1   :  { %s8_s14 = sshll.u32 %s931_s0, 4  ;;  %s9_s14 = int_to_ptr.vmem [resolvable:$true] %s8_s14 }
   0x2   :  { %s664_s15 = scalar_lea.vmem %s9_s14, 16  ;;  %p669_p1 = scmp.lt.s32.totalorder %s9_s14, %s9_s14 }
   0x3   :  { %p665_p0 = scmp.ne.s32.totalorder %s9_s14, %s664_s15  ;;  %p670_p2 = scmp.lt.s32.totalorder %s664_s15, %s664_s15 }
   0x5   :  { %p671_p3 = por %p670_p2, %p669_p1 }
   0x7   :  { %p672_p4 = pnand %p671_p3, %p665_p0 }
   0x9   :  { %675 = shalt.err (!%p672_p4)  }
   0xa   :  { %s758_s16 = smov [#allocation3]  }
   0xb   :  { %11 = dma.vmem_to_smem %s9_s14, 16, %s758_s16, [#allocation2] }
   0xc   :  { %728 = dma.done.wait [#allocation2], 16 }
   0xd   :  { %729 = vsyncadd [#allocation2], 4294967280 }
   0xe   :  { %13 = sfence }
   0xf   :  { %14 = vsyncpa [#allocation5], 0 }
  0x10   :  { %16 = vsyncpa [#allocation5 + $0x1], 0  ;;  %s785_s17 = smov 0   ;;  %s787_s18 = smov 0  }
  0x11   :  { %s789_s0 = smov 0   ;;  %s791_s19 = smov 0  }
  0x12   :  { %s793_s20 = smov 0   ;;  %s795_s21 = smov 0  }
  0x13 LB: > { %s587_s22 = sadd.s32 4294967295, %s756_s21   ;;  %s588_s23 = sadd.s32 4294967294, %s756_s21   ;;  %s756_s21 = sphi %s795_s21, %s22_s21   ;;  %s752_s20 = sphi %s793_s20, %s941_s20   ;;  %s748_s19 = sphi %s791_s19, %s940_s19   ;;  %s744_s0 = sphi %s789_s0, %s939_s0   ;;  %s740_s18 = sphi %s787_s18, %s938_s18   ;;  %s736_s17 = sphi %s785_s17, %s937_s17  }
  0x14   : > { %s34_s24 = sadd.s32 1, %s752_s20  ;;  %s117_s25 = sadd.s32 1, %s744_s0 }
  0x15   : > { %p36_p5 = scmp.ge.s32.totalorder %s34_s24, 3  ;;  %p127_p6 = scmp.ne.s32.totalorder %s744_s0, %s740_s18 }
  0x16   : > { %p128_p7 = scmp.eq.s32.totalorder %s587_s22, 2  ;;  %p133_p8 = scmp.ne.s32.totalorder %s740_s18, %s736_s17 }
  0x17   : > { %s943_s24 = smov (%p36_p5, %s34_s24), 0  ;;  %p134_p10 = scmp.eq.s32.totalorder %s588_s23, 2 }
  0x18   : > { %p825_p9 = por %p128_p7, %p127_p6  ;;  %s114_s27 = ssub.s32 %s752_s20, %s943_s24 }
  0x19   : > { %p591_p11 = scmp.ge.s32.totalorder %s756_s21, 1  ;;  %p115_p12 = scmp.eq.s32.totalorder %s114_s27, 0 }
  0x1a   : > { %p832_p13 = por %p134_p10, %p133_p8  ;;  %p198_p0 = scmp.lt.s32.totalorder %s756_s21, 4 }
  0x1b   : > { %s838_s29 = scalar_select %p115_p12, %s744_s0, %s117_s25  }
  0x1c   : > { %p199_p1 = pnand %p591_p11, %p198_p0 }
  0x1d   : > { %s240_s30 = sand.u32 (!%p199_p1), 1, %s740_s18   ;;  %s243_s4 = sld [smem:[#allocation3 + %s748_s19]] (!%p199_p1)  ;;  %v759_v0 = vmov (!%p199_p1), -1e+30  }
  0x1e   : > { %202 = sbr.rel (%p199_p1) target bundleno = 250 (0xfa), region = 28  ;;  %s592_s5 = sshll.u32 (!%p199_p1), %s240_s30, 3 }
  0x1f   : > { %s263_s6 = sld [smem:[#allocation3 + %s748_s19]] (!%p199_p1)  ;;  %s846_s8 = scalar_lea.vmem (!%p199_p1), [#allocation4], %s592_s5 }
  0x20   : > { %s288_s7 = sld [smem:[#allocation3 + %s748_s19]] (!%p199_p1)  ;;  %287 = vst [vmem:[%s846_s8] sm:$0xff] (!%p199_p1), %v759_v0 }
  0x23   : > { %p244_p2 = scmp.gt.s32.totalorder (!%p199_p1), %s243_s4, 0 }
  0x25   : > { %p264_p3 = scmp.gt.s32.totalorder %s263_s6, 0 }
  0x26   : > { %s245_s9 = scalar_select %p244_p2, 1, 0 }
  0x27   : > { %s265_s10 = scalar_select %p264_p3, 1, 0 }
  0x28   : > { %s246_s11 = smul.u32 %s748_s19, %s245_s9  ;;  %p597_p6 = scmp.le.s32.totalorder %s288_s7, 0 }
  0x29   : > { %s266_s12 = smul.u32 %s748_s19, %s265_s10  ;;  %v760_v3 = vmov (!%p597_p6), 0  }
  0x2a   : > { %p249_p4 = scmp.lt.s32.totalorder %s246_s11, 2  ;;  %292 = sbr.rel (%p597_p6) target bundleno = 226 (0xe2), region = 36  ;;  %663 = vset.pattern.permute.xlu1 (!%p597_p6), %v760_v3  ;;  %662 = vset.pattern.permute.xlu0 (!%p597_p6), %v760_v3 }
  0x2b   : > { %p269_p5 = scmp.lt.s32.totalorder %s266_s12, 2 }
  0x2c   : > { %s945_s11 = smov (!%p249_p4, %s246_s11), 2 }
  0x2d   : > { %s947_s12 = smov (!%p269_p5, %s266_s12), 2  ;;  %s602_s13 = sshll.u32 %s945_s11, 4 }
  0x2e   : > { %s256_s16 = scalar_lea.vmem %s932_s1, %s602_s13  ;;  %s603_s22 = sshll.u32 %s947_s12, 4 }
  0x2f   : > { %s857_s27 = scalar_lea.vmem %s933_s2, %s603_s22  ;;  %v295_v1 = vld [vmem:[%s256_s16] sm:$0xff] (!%p597_p6)  ;;  %v296_v2 = vld [vmem:[%s256_s16 + $0x8] sm:$0xff] (!%p597_p6) }
  0x30   : > { %vm318_vm0 = vcmp.eq.s32.totalorder (!%p597_p6), %v295_v1, 1  ;;  %vm297_vm1 = vcmp.eq.s32.totalorder (!%p597_p6), %v295_v1, 0  ;;  %vm319_vm2 = vcmp.eq.s32.totalorder (!%p597_p6), %v296_v2, 1  ;;  %vm298_vm3 = vcmp.eq.s32.totalorder (!%p597_p6), %v296_v2, 0  ;;  %v860_v23 = vld [vmem:[%s857_s27 + $0x8] sm:$0xff] (!%p597_p6)  ;;  %v863_v25 = vld [vmem:[%s857_s27] sm:$0xff] (!%p597_p6) }
  0x31   : > { %v320_v4 = vsel %vm318_vm0, 1, %v760_v3  ;;  %v299_v5 = vsel %vm297_vm1, 1, %v760_v3  ;;  %v321_v6 = vsel %vm319_vm2, 1, %v760_v3  ;;  %v300_v7 = vsel %vm298_vm3, 1, %v760_v3 }
  0x32   : > { %323 = vperm.xlu1 %663, %v320_v4   ;;  %302 = vperm.xlu0 %662, %v299_v5   ;;  %vm340_vm4 = vcmp.eq.s32.totalorder %v296_v2, 2  ;;  %vm339_vm5 = vcmp.eq.s32.totalorder %v295_v1, 2  ;;  %vm361_vm6 = vcmp.eq.s32.totalorder %v296_v2, 3  ;;  %vm360_vm7 = vcmp.eq.s32.totalorder %v295_v1, 3 }
  0x33   : > { %v342_v8 = vsel %vm340_vm4, 1, %v760_v3  ;;  %v341_v9 = vsel %vm339_vm5, 1, %v760_v3  ;;  %v363_v10 = vsel %vm361_vm6, 1, %v760_v3  ;;  %v362_v11 = vsel %vm360_vm7, 1, %v760_v3 }
  0x34   : > { %vm382_vm8 = vcmp.eq.s32.totalorder %v296_v2, 4  ;;  %vm381_vm9 = vcmp.eq.s32.totalorder %v295_v1, 4  ;;  %vm403_vm10 = vcmp.eq.s32.totalorder %v296_v2, 5  ;;  %vm402_vm11 = vcmp.eq.s32.totalorder %v295_v1, 5 }
  0x35   : > { %v384_v12 = vsel %vm382_vm8, 1, %v760_v3  ;;  %v383_v13 = vsel %vm381_vm9, 1, %v760_v3  ;;  %v405_v14 = vsel %vm403_vm10, 1, %v760_v3  ;;  %v404_v15 = vsel %vm402_vm11, 1, %v760_v3 }
  0x36   : > { %326 = vperm.xlu1 %663, %v321_v6   ;;  %305 = vperm.xlu0 %662, %v300_v7   ;;  %vm424_vm12 = vcmp.eq.s32.totalorder %v296_v2, 6  ;;  %vm423_vm13 = vcmp.eq.s32.totalorder %v295_v1, 6  ;;  %vm445_vm14 = vcmp.eq.s32.totalorder %v296_v2, 7  ;;  %vm444_vm15 = vcmp.eq.s32.totalorder %v295_v1, 7 }
  0x37   : > { %v426_v16 = vsel %vm424_vm12, 1, %v760_v3  ;;  %v425_v17 = vsel %vm423_vm13, 1, %v760_v3  ;;  %v447_v18 = vsel %vm445_vm14, 1, %v760_v3  ;;  %v446_v19 = vsel %vm444_vm15, 1, %v760_v3 }
  0x3a   : > { %347 = vperm.xlu1 %663, %v342_v8   ;;  %344 = vperm.xlu0 %662, %v341_v9  }
  0x3e   : > { %368 = vperm.xlu1 %663, %v363_v10   ;;  %365 = vperm.xlu0 %662, %v362_v11  }
  0x42   : > { %389 = vperm.xlu1 %663, %v384_v12   ;;  %386 = vperm.xlu0 %662, %v383_v13  }
  0x46   : > { %410 = vperm.xlu1 %663, %v405_v14   ;;  %407 = vperm.xlu0 %662, %v404_v15  }
  0x4a   : > { %431 = vperm.xlu1 %663, %v426_v16   ;;  %428 = vperm.xlu0 %662, %v425_v17  }
  0x4e   : > { %452 = vperm.xlu1 %663, %v447_v18   ;;  %449 = vperm.xlu0 %662, %v446_v19  }
  0xb1   : > { %v324_v20 = vpop.permute.xlu1 %323  ;;  %v303_v21 = vpop.permute.xlu0 %302 }
  0xb2   : > { %vm328_vm2 = vcmp.eq.s32.totalorder %v324_v20, 1  ;;  %vm307_vm3 = vcmp.eq.s32.totalorder %v303_v21, 1 }
  0xb3   : > { %v330_v30 = vsel %vm328_vm2, %v863_v25, -1e+30  ;;  %v309_v31 = vsel %vm307_vm3, %v863_v25, -1e+30  ;;  %vm469_vm2 = vcmask 1042432   ;;  %vm471_vm3 = vcmask 1043456  }
  0xb5   : > { %v327_v22 = vpop.permute.xlu1 %326  ;;  %v306_v24 = vpop.permute.xlu0 %305 }
  0xb6   : > { %vm329_vm0 = vcmp.eq.s32.totalorder %v327_v22, 1  ;;  %vm308_vm1 = vcmp.eq.s32.totalorder %v306_v24, 1 }
  0xb7   : > { %v331_v26 = vsel %vm329_vm0, %v860_v23, -1e+30  ;;  %v310_v27 = vsel %vm308_vm1, %v860_v23, -1e+30  ;;  %vm465_vm0 = vcmask 1040384   ;;  %vm467_vm1 = vcmask 1041408  }
  0xb8   : > { %v332_v32 = vmax.f32 %v330_v30, %v331_v26  ;;  %v311_v35 = vmax.f32 %v309_v31, %v310_v27 }
  0xb9   : > { %v348_v28 = vpop.permute.xlu1 %347  ;;  %v345_v29 = vpop.permute.xlu0 %344 }
  0xba   : > { %vm350_vm4 = vcmp.eq.s32.totalorder %v348_v28, 1  ;;  %vm349_vm5 = vcmp.eq.s32.totalorder %v345_v29, 1  ;;  %v333_v39 = vrot.slane %v332_v32, 4  ;;  %v312_v41 = vrot.slane %v311_v35, 4 }
  0xbb   : > { %v352_v33 = vsel %vm350_vm4, %v860_v23, -1e+30  ;;  %v351_v34 = vsel %vm349_vm5, %v863_v25, -1e+30  ;;  %vm473_vm4 = vcmask 1044480   ;;  %vm475_vm5 = vcmask 1045504  }
  0xbc   : > { %v353_v36 = vmax.f32 %v351_v34, %v352_v33  ;;  %v334_v47 = vmax.f32 %v332_v32, %v333_v39  ;;  %v313_v50 = vmax.f32 %v311_v35, %v312_v41 }
  0xbd   : > { %v369_v37 = vpop.permute.xlu1 %368  ;;  %v366_v38 = vpop.permute.xlu0 %365 }
  0xbe   : > { %vm371_vm6 = vcmp.eq.s32.totalorder %v369_v37, 1  ;;  %vm370_vm7 = vcmp.eq.s32.totalorder %v366_v38, 1  ;;  %v354_v43 = vrot.slane %v353_v36, 4  ;;  %v335_v57 = vrot.slane %v334_v47, 2 }
  0xbf   : > { %v373_v40 = vsel %vm371_vm6, %v860_v23, -1e+30  ;;  %v372_v42 = vsel %vm370_vm7, %v863_v25, -1e+30  ;;  %v314_v61 = vrot.slane %v313_v50, 2  ;;  %vm477_vm6 = vcmask 1046528  }
  0xc0   : > { %v374_v44 = vmax.f32 %v372_v42, %v373_v40  ;;  %v355_v52 = vmax.f32 %v353_v36, %v354_v43  ;;  %v336_v5 = vmax.f32 %v334_v47, %v335_v57 }
  0xc1   : > { %v390_v45 = vpop.permute.xlu1 %389  ;;  %v387_v46 = vpop.permute.xlu0 %386  ;;  %v315_v9 = vmax.f32 %v313_v50, %v314_v61  ;;  %v479_v50 = vld [vmem:[%s846_s8] sm:$0xff] }
  0xc2   : > { %vm392_vm8 = vcmp.eq.s32.totalorder %v390_v45, 1  ;;  %v375_v48 = vrot.slane %v374_v44, 4  ;;  %vm391_vm9 = vcmp.eq.s32.totalorder %v387_v46, 1  ;;  %v356_v63 = vrot.slane %v355_v52, 2 }
  0xc3   : > { %v394_v49 = vsel %vm392_vm8, %v860_v23, -1e+30  ;;  %v393_v51 = vsel %vm391_vm9, %v863_v25, -1e+30  ;;  %v337_v18 = vrot.slane %v336_v5, 1  ;;  %v316_v22 = vrot.slane %v315_v9, 1 }
  0xc4   : > { %v376_v53 = vmax.f32 %v374_v44, %v375_v48  ;;  %v395_v54 = vmax.f32 %v393_v51, %v394_v49  ;;  %v357_v12 = vmax.f32 %v355_v52, %v356_v63 }
  0xc5   : > { %v411_v55 = vpop.permute.xlu1 %410  ;;  %v408_v56 = vpop.permute.xlu0 %407  ;;  %v338_v32 = vmax.f32 %v336_v5, %v337_v18  ;;  %v317_v34 = vmax.f32 %v315_v9, %v316_v22 }
  0xc6   : > { %vm413_vm10 = vcmp.eq.s32.totalorder %v411_v55, 1  ;;  %vm412_vm11 = vcmp.eq.s32.totalorder %v408_v56, 1  ;;  %v396_v58 = vrot.slane %v395_v54, 4  ;;  %v377_v0 = vrot.slane %v376_v53, 2 }
  0xc7   : > { %v415_v59 = vsel %vm413_vm10, %v860_v23, -1e+30  ;;  %v414_v60 = vsel %vm412_vm11, %v863_v25, -1e+30  ;;  %v358_v28 = vrot.slane %v357_v12, 1  ;;  %v466_v41 = vsel %vm465_vm0, %v317_v34, %v338_v32 }
  0xc8   : > { %v416_v62 = vmax.f32 %v414_v60, %v415_v59  ;;  %v397_v1 = vmax.f32 %v395_v54, %v396_v58  ;;  %v378_v13 = vmax.f32 %v376_v53, %v377_v0 }
  0xc9   : > { %v432_v2 = vpop.permute.xlu1 %431  ;;  %v429_v3 = vpop.permute.xlu0 %428  ;;  %v359_v38 = vmax.f32 %v357_v12, %v358_v28 }
  0xca   : > { %v417_v4 = vrot.slane %v416_v62, 4  ;;  %vm434_vm12 = vcmp.eq.s32.totalorder %v432_v2, 1  ;;  %vm433_vm13 = vcmp.eq.s32.totalorder %v429_v3, 1  ;;  %v398_v6 = vrot.slane %v397_v1, 2 }
  0xcb   : > { %v436_v7 = vsel %vm434_vm12, %v860_v23, -1e+30  ;;  %v435_v8 = vsel %vm433_vm13, %v863_v25, -1e+30  ;;  %v379_v29 = vrot.slane %v378_v13, 1  ;;  %v468_v44 = vsel %vm467_vm1, %v466_v41, %v359_v38 }
  0xcc   : > { %v418_v10 = vmax.f32 %v416_v62, %v417_v4  ;;  %v437_v11 = vmax.f32 %v435_v8, %v436_v7  ;;  %v399_v19 = vmax.f32 %v397_v1, %v398_v6 }
  0xcd   : > { %v453_v14 = vpop.permute.xlu1 %452  ;;  %v450_v15 = vpop.permute.xlu0 %449 }
  0xce   : > { %v419_v16 = vrot.slane %v418_v10, 2  ;;  %v438_v17 = vrot.slane %v437_v11, 4  ;;  %vm455_vm14 = vcmp.eq.s32.totalorder %v453_v14, 1  ;;  %vm454_vm15 = vcmp.eq.s32.totalorder %v450_v15, 1 }
  0xcf   : > { %v457_v20 = vsel %vm455_vm14, %v860_v23, -1e+30  ;;  %v456_v21 = vsel %vm454_vm15, %v863_v25, -1e+30  ;;  %v400_v33 = vrot.slane %v399_v19, 1  ;;  %v380_v23 = vmax.f32 %v378_v13, %v379_v29 }
  0xd0   : > { %v420_v24 = vmax.f32 %v418_v10, %v419_v16  ;;  %v439_v26 = vmax.f32 %v437_v11, %v438_v17  ;;  %v458_v27 = vmax.f32 %v456_v21, %v457_v20 }
  0xd1   : > { %v401_v40 = vmax.f32 %v399_v19, %v400_v33  ;;  %v470_v46 = vsel %vm469_vm2, %v468_v44, %v380_v23 }
  0xd2   : > { %v440_v30 = vrot.slane %v439_v26, 2  ;;  %v459_v31 = vrot.slane %v458_v27, 4  ;;  %v421_v35 = vrot.slane %v420_v24, 1 }
  0xd3   : > { %v472_v48 = vsel %vm471_vm3, %v470_v46, %v401_v40 }
  0xd4   : > { %v441_v36 = vmax.f32 %v439_v26, %v440_v30  ;;  %v460_v37 = vmax.f32 %v458_v27, %v459_v31  ;;  %v422_v42 = vmax.f32 %v420_v24, %v421_v35 }
  0xd6   : > { %v442_v39 = vrot.slane %v441_v36, 1  ;;  %v461_v25 = vrot.slane %v460_v37, 2  ;;  %v474_v49 = vsel %vm473_vm4, %v472_v48, %v422_v42 }
  0xd8   : > { %v462_v43 = vmax.f32 %v460_v37, %v461_v25  ;;  %v443_v45 = vmax.f32 %v441_v36, %v442_v39 }
  0xda   : > { %v463_v47 = vrot.slane %v462_v43, 1  ;;  %v476_v52 = vsel %vm475_vm5, %v474_v49, %v443_v45 }
  0xdc   : > { %v464_v51 = vmax.f32 %v462_v43, %v463_v47 }
  0xde   : > { %v478_v53 = vsel %vm477_vm6, %v476_v52, %v464_v51 }
  0xdf   : > { %v480_v54 = vmax.f32 %v479_v50, %v478_v53 }
  0xe1   : > { %481 = vst [vmem:[%s846_s8] sm:$0xff] %v480_v54 }
  0xe2 PF: > { %s599_s4 = sshll.u32 %s748_s19, 7  ;;  %s496_s9 = sshll.u32 %s846_s8, 4  ;;  %s497_s9 = int_to_ptr.vmem [resolvable:$true] %s496_s9 }
  0xe3   : > { %s887_s7 = scalar_lea.hbm %s934_s3, %s599_s4  ;;  %s483_s10 = scalar_lea.sflag [#allocation5], %s240_s30 }
  0xe4   : > { %s676_s11 = scalar_lea.vmem %s497_s9, 128  ;;  %s761_s12 = smov [#allocation4]  }
  0xe5   : > { %p677_p7 = scmp.ne.s32.totalorder %s497_s9, %s676_s11  ;;  %s680_s13 = sshll.u32 %s761_s12, 4  ;;  %s681_s13 = int_to_ptr.vmem [resolvable:$false] %s680_s13 }
  0xe6   : > { %s682_s14 = scalar_lea.vmem %s681_s13, 256  ;;  %p683_p11 = scmp.lt.s32.totalorder %s497_s9, %s681_s13 }
  0xe7   : > { %p678_p8 = pnand %p677_p7, %p825_p9  ;;  %p684_p12 = scmp.lt.s32.totalorder %s682_s14, %s676_s11 }
  0xe9   : > { %p679_p10 = pneg %p678_p8  ;;  %p685_p0 = por %p684_p12, %p683_p11 }
  0xeb   : > { %p686_p1 = pnand %p685_p0, %p679_p10 }
  0xed   : > { %689 = shalt.err (!%p686_p1)
}
  0xee   : > { %s690_s19 = scalar_lea.hbm %s887_s7, 128  ;;  %s694_s15 = scalar_lea.hbm %s934_s3, 384 }
  0xef   : > { %p691_p2 = scmp.ne.s32.totalorder %s887_s7, %s690_s19  ;;  %p695_p5 = scmp.lt.u32.totalorder %s887_s7, %s934_s3 }
  0xf0   : > { %p696_p6 = scmp.lt.u32.totalorder %s694_s15, %s690_s19  ;;  %p698_p8 = scmp.lt.u32.totalorder %s690_s19, %s887_s7 }
  0xf1   : > { %p692_p3 = pnand %p691_p2, %p825_p9 }
  0xf2   : > { %p697_p7 = por %p696_p6, %p695_p5 }
  0xf3   : > { %p693_p4 = pneg %p692_p3 }
  0xf4   : > { %p699_p10 = por %p698_p8, %p697_p7 }
  0xf6   : > { %p700_p11 = pnand %p699_p10, %p693_p4 }
  0xf8   : > { %703 = shalt.err (!%p700_p11)
}
  0xf9   : > { %604 = dma.vmem_to_hbm [thread:$0]  (%p825_p9), %s497_s9, 128, %s887_s7, %s483_s10  }
  0xfa PF: > { %p610_p12 = scmp.ge.s32.totalorder %s756_s21, 2  ;;  %s508_s23 = sand.u32 1, %s736_s17  }
  0xfb   : > { %s509_s25 = scalar_lea.sflag [#allocation5], %s508_s23 }
  0xfc   : > { %p607_p0 = pnand %p610_p12, %p832_p13 }
  0xfe   : > { %731 = dma.done.wait (!%p607_p0), %s509_s25, 128  }
  0xff   : > { %733 = vsyncadd (!%p607_p0), %s509_s25, 4294967168  ;;  %s22_s21 = sadd.s32 1, %s756_s21   ;;  %s937_s17 = smov %s740_s18 }
 0x100   : > { %p19_p1 = scmp.ge.s32.totalorder %s22_s21, 5   ;;  %s938_s18 = smov %s744_s0 }
 0x101   : > { %s939_s0 = smov %s838_s29  ;;  %s940_s19 = smov %s752_s20 }
 0x102   : > { %s941_s20 = smov %s943_s24  ;;  %21 = sbr.rel (!%p19_p1) target bundleno = 19 (0x13), region = 74 }
 0x109   :  { %514 = vsyncpa [#allocation5], 1 }
 0x10a   :  { %516 = vsyncpa [#allocation5 + $0x1], 1 }

</bundles_post_ra>
